<compile_context>
chip_gen: v6e
topology: v6e:2x2x1
jax: 0.10.0
libtpu: 0.0.40
codegen_flags: <defaults>
</compile_context>

<pallas_src>
import jax
import jax.numpy as jnp
from jax.experimental import pallas as pl
from jax.experimental.pallas import tpu as pltpu


# ----------------------------- small-B path ---------------------------------
def _linear1_small_kernel(x_ref, w_ref, b_ref, o_ref):
    # x_ref: (B, 1)   input column
    # w_ref: (1, OUT) weight row (== weight.T since in_f == 1)
    # b_ref: (1, OUT) bias row
    # o_ref: (B, OUT)
    o_ref[...] = (x_ref[...] * w_ref[...] + b_ref[...]).astype(o_ref.dtype)


def linear_pallas_small(x, weight, bias):
    """Single-block Pallas path for small B. y = x @ weight.T + bias."""
    B, in_f = x.shape
    out_f, in_f2 = weight.shape
    assert in_f == in_f2 == 1, "kernel specialized for Linear(1, out_f)"

    w_row = weight.reshape(1, out_f)  # free row-major reshape (in_f == 1)
    b_row = bias.reshape(1, out_f)

    itemsize = jnp.dtype(x.dtype).itemsize
    bytes_accessed = (x.size + w_row.size + b_row.size + B * out_f) * itemsize

    return pl.pallas_call(
        _linear1_small_kernel,
        out_shape=jax.ShapeDtypeStruct((B, out_f), x.dtype),
        in_specs=[
            pl.BlockSpec((B, in_f), lambda: (0, 0)),
            pl.BlockSpec((1, out_f), lambda: (0, 0)),
            pl.BlockSpec((1, out_f), lambda: (0, 0)),
        ],
        out_specs=pl.BlockSpec((B, out_f), lambda: (0, 0)),
        cost_estimate=pl.CostEstimate(
            flops=2 * B * out_f, transcendentals=0, bytes_accessed=bytes_accessed
        ),
    )(x, w_row, b_row)


# ---------------------------- scaled-B path ----------------------------------
def _linear1_tiled_kernel(xr_ref, w_ref, b_ref, ot_ref):
    # xr_ref: (1, BT)     lane-dense batch slice of x (x presented as a row)
    # w_ref : (OUT, 1)    weight column
    # b_ref : (OUT, 1)    bias column
    # ot_ref: (OUT, BT)   lane-dense transposed output slab
    ot_ref[...] = (w_ref[...] * xr_ref[...] + b_ref[...]).astype(ot_ref.dtype)


def linear_pallas_tiled(x, weight, bias, *, block_rows=1024):
    """Batch-tiled Pallas path for large B with lane-dense output stores."""
    B, in_f = x.shape
    out_f, in_f2 = weight.shape
    assert in_f == in_f2 == 1, "kernel specialized for Linear(1, out_f)"
    assert B % block_rows == 0 and block_rows % 128 == 0

    x_row = x.reshape(1, B)            # free (in_f == 1): same bytes as x.T
    w_col = weight.reshape(out_f, 1)
    b_col = bias.reshape(out_f, 1)

    itemsize = jnp.dtype(x.dtype).itemsize
    bytes_accessed = (x.size + w_col.size + b_col.size + B * out_f) * itemsize

    y_t = pl.pallas_call(
        _linear1_tiled_kernel,
        out_shape=jax.ShapeDtypeStruct((out_f, B), x.dtype),
        grid=(B // block_rows,),
        in_specs=[
            pl.BlockSpec((1, block_rows), lambda i: (0, i)),
            pl.BlockSpec((out_f, 1), lambda i: (0, 0)),
            pl.BlockSpec((out_f, 1), lambda i: (0, 0)),
        ],
        out_specs=pl.BlockSpec((out_f, block_rows), lambda i: (0, i)),
        compiler_params=pltpu.CompilerParams(
            dimension_semantics=("parallel",),       # 2x on v7x's 2 TCs, free elsewhere
            vmem_limit_bytes=32 * 1024 * 1024,       # explicit budget, safe on v7x 64 MiB
        ),
        cost_estimate=pl.CostEstimate(
            flops=2 * B * out_f, transcendentals=0, bytes_accessed=bytes_accessed
        ),
    )(x_row, w_col, b_col)

    # Layout plumbing back to the module's (B, out_f) convention.
    return y_t.T


# ------------------------------ dispatcher -----------------------------------
def linear_forward(x, weight, bias, *, force_pallas=False):
    """y = self.fc(x) for fc = nn.Linear(1, out_f). Routes by problem size."""
    B, in_f = x.shape
    out_f, in_f2 = weight.shape
    assert in_f == in_f2 == 1, "kernel specialized for Linear(1, out_f)"

    # Scaled path: large, divisible batch -> tiled Pallas kernel.
    if B >= 256:
        for bt in (1024, 512, 256, 128):
            if B % bt == 0:
                return linear_pallas_tiled(x, weight, bias, block_rows=bt)

    # Tiny path: a fused XLA elementwise op beats custom-call dispatch overhead.
    if not force_pallas and B * out_f < 4096:
        return x * weight.reshape(1, out_f) + bias.reshape(1, out_f)

    return linear_pallas_small(x, weight, bias)


if __name__ == "__main__":
    key = jax.random.PRNGKey(0)
    k_x, k_w, k_b, k_x2 = jax.random.split(key, 4)

    IN_F, OUT_F = 1, 2

    # PyTorch Linear default init: U(-1/sqrt(in_f), 1/sqrt(in_f))
    bound = 1.0 / (IN_F ** 0.5)
    weight = jax.random.uniform(k_w, (OUT_F, IN_F), jnp.float32, -bound, bound)
    bias = jax.random.uniform(k_b, (OUT_F,), jnp.float32, -bound, bound)

    # --- small problem matching the module spec (batch = 8) ---
    B_SMALL = 8
    x_small = jax.random.normal(k_x, (B_SMALL, IN_F), jnp.float32)
    ref_small = x_small @ weight.T + bias

    y_small = linear_pallas_small(x_small, weight, bias)   # exercise Pallas path
    jax.block_until_ready(y_small)
    assert y_small.shape == (B_SMALL, OUT_F)
    assert jnp.allclose(y_small, ref_small, atol=1e-5, rtol=1e-5)

    y_disp = linear_forward(x_small, weight, bias)          # default routing (fused XLA)
    jax.block_until_ready(y_disp)
    assert jnp.allclose(y_disp, ref_small, atol=1e-5, rtol=1e-5)

    # --- scaled-B path: batch-tiled, lane-dense output, parallel batch axis ---
    B_LARGE = 4096
    x_large = jax.random.normal(k_x2, (B_LARGE, IN_F), jnp.float32)
    y_large = linear_forward(x_large, weight, bias)
    jax.block_until_ready(y_large)
    ref_large = x_large @ weight.T + bias
    assert y_large.shape == (B_LARGE, OUT_F)
    assert jnp.allclose(y_large, ref_large, atol=1e-5, rtol=1e-5)

    print("KERNEL_OK")
</pallas_src>

<mosaic_0001>
module attributes {stable_mosaic.version = 11 : i64} {
  func.func @_linear1_small_kernel(%arg0: memref<8x1xf32, #tpu.memory_space<vmem>>, %arg1: memref<1x2xf32, #tpu.memory_space<vmem>>, %arg2: memref<1x2xf32, #tpu.memory_space<vmem>>, %arg3: memref<8x2xf32, #tpu.memory_space<vmem>>) attributes {dimension_semantics = [], scalar_prefetch = 0 : i64, scratch_operands = 0 : i64, tpu.core_type = #tpu.core_type<tc>} {
    %c0 = arith.constant 0 : index
    %c0_0 = arith.constant 0 : index
    %0 = vector.load %arg0[%c0, %c0_0] : memref<8x1xf32, #tpu.memory_space<vmem>>, vector<8x1xf32>
    %c0_1 = arith.constant 0 : index
    %c0_2 = arith.constant 0 : index
    %1 = vector.load %arg1[%c0_1, %c0_2] : memref<1x2xf32, #tpu.memory_space<vmem>>, vector<1x2xf32>
    %2 = vector.broadcast %0 : vector<8x1xf32> to vector<8x2xf32>
    %3 = vector.broadcast %1 : vector<1x2xf32> to vector<8x2xf32>
    %4 = arith.mulf %2, %3 : vector<8x2xf32>
    %c0_3 = arith.constant 0 : index
    %c0_4 = arith.constant 0 : index
    %5 = vector.load %arg2[%c0_3, %c0_4] : memref<1x2xf32, #tpu.memory_space<vmem>>, vector<1x2xf32>
    %6 = vector.broadcast %5 : vector<1x2xf32> to vector<8x2xf32>
    %7 = arith.addf %4, %6 : vector<8x2xf32>
    %c0_5 = arith.constant 0 : index
    %c0_6 = arith.constant 0 : index
    %8 = vector.load %arg3[%c0_5, %c0_6] : memref<8x2xf32, #tpu.memory_space<vmem>>, vector<8x2xf32>
    tpu.vector_store %arg3[%c0_5, %c0_6], %7 {strides = array<i32>} : memref<8x2xf32, #tpu.memory_space<vmem>>, vector<8x2xf32>,
    return
  }
}

</mosaic_0001>

<bundles_post_ra>
// kernel: tpu_custom_call.1
= control target key start
LH: loop header
LB: loop body
LE: loop exit
PB: predicated region body
PF: predicated region fallthrough
CT: control target
= control target key end

     0   :  { %v46_v0 = vmov 0   ;;  %vm36_vm0 = vcmask 15360   ;;  %s79_s0 = inlined_call_operand.vmem [shape: f32[8,1], index: 0, kind: input, shape index: {}]   ;;  %s80_s1 = inlined_call_operand.vmem [shape: f32[1,2], index: 1, kind: input, shape index: {}]   ;;  %s81_s2 = inlined_call_operand.vmem [shape: f32[1,2], index: 2, kind: input, shape index: {}]   ;;  %s82_s3 = inlined_call_operand.vmem [shape: f32[8,2], index: 3, kind: output, shape index: {}]  }
   0x1   :  { %45 = vset.pattern.permute.xlu0 %v46_v0  ;;  %v14_v1 = vld [vmem:[%s79_s0] sm:$0xff] }
   0x2   :  { %18 = vperm.xlu0 %45, %v14_v1   ;;  %v42_v2 = vld [vmem:[%s80_s1] ss:$0 sm:$0xff] }
   0x3   :  { %v43_v3 = vld [vmem:[%s81_s2] ss:$0 sm:$0xff] }
  0x7d   :  { %v19_v4 = vpop.permute.xlu0 %18 }
  0x7e   :  { %v27_v5 = vmul.f32 %v42_v2, %v19_v4 }
  0x80   :  { %v35_v6 = vadd.f32 %v43_v3, %v27_v5 }
  0x82   :  { %37 = vst.msk [vmem:[%s82_s3] sm:$0xff] %vm36_vm0, %v35_v6 }

</bundles_post_ra>
